<compile_context>
chip_gen: v6e
topology: v6e:2x2x1
jax: 0.10.0
libtpu: 0.0.40
codegen_flags: <defaults>
</compile_context>

<pallas_src>
import functools

import jax
import jax.numpy as jnp
from jax.experimental import pallas as pl
from jax.experimental.pallas import tpu as pltpu


def _round_up(n, m):
    return ((n + m - 1) // m) * m


def mlp_kernel(x_ref, w1_ref, b1_ref, w2_ref, b2_ref, w3_ref, b3_ref, o_ref):
    """Whole forward pass for one batch tile: 3 MXU matmuls + VPU ReLU/bias."""
    x = x_ref[...]
    h = jnp.dot(x, w1_ref[...], preferred_element_type=jnp.float32) + b1_ref[...]
    h = jnp.maximum(h, 0.0)                      # ReLU
    h = jnp.dot(h, w2_ref[...], preferred_element_type=jnp.float32) + b2_ref[...]
    h = jnp.maximum(h, 0.0)                      # ReLU
    o = jnp.dot(h, w3_ref[...], preferred_element_type=jnp.float32) + b3_ref[...]
    # Store only the true output lanes (masked partial store; tiny writeback).
    o_ref[...] = o[:, : o_ref.shape[-1]].astype(o_ref.dtype)


def pad_params(w1, b1, w2, b2, w3, b3):
    """One-time weight/bias padding (hoisted out of the per-call hot path).

    wK: [in, out] float32 (transposed relative to torch.nn.Linear.weight)
    bK: [out]     float32
    Input feature dim is padded only to a multiple of 8 (sublane); hidden /
    output dims are padded to multiples of 128 (lane).  Zero padding is
    mathematically inert (zero weight rows/cols, zero bias, ReLU(0)=0).
    """
    d_in, h1 = w1.shape
    h2 = w2.shape[1]
    d_out = w3.shape[1]

    dinp = _round_up(d_in, 8)
    h1p = _round_up(h1, 128)
    h2p = _round_up(h2, 128)
    doutp = _round_up(d_out, 128)

    f32 = jnp.float32
    w1p = jnp.zeros((dinp, h1p), f32).at[:d_in, :h1].set(w1.astype(f32))
    b1p = jnp.zeros((1, h1p), f32).at[0, :h1].set(b1.astype(f32))
    w2p = jnp.zeros((h1p, h2p), f32).at[:h1, :h2].set(w2.astype(f32))
    b2p = jnp.zeros((1, h2p), f32).at[0, :h2].set(b2.astype(f32))
    w3p = jnp.zeros((h2p, doutp), f32).at[:h2, :d_out].set(w3.astype(f32))
    b3p = jnp.zeros((1, doutp), f32).at[0, :d_out].set(b3.astype(f32))
    return w1p, b1p, w2p, b2p, w3p, b3p


@functools.partial(jax.jit, static_argnames=("n_outputs", "max_tile_m"))
def nnet_forward(x, w1p, b1p, w2p, b2p, w3p, b3p, *, n_outputs, max_tile_m=1024):
    """Runs the padded-weight MLP kernel on x: [N, d_in] float32 -> [N, n_outputs]."""
    n, d_in = x.shape
    dinp, h1p = w1p.shape
    h2p = w2p.shape[1]
    doutp = w3p.shape[1]

    # Batch tile: whole (8-aligned) batch when small -> grid=(1,); otherwise
    # 1024-row tiles (multiple of 256 and 128 -> MXU-shaped on all chips,
    # ~<1 MiB/tile of activations -> safely inside every VMEM budget).
    tile_m = min(_round_up(n, 8), max_tile_m)
    np_ = _round_up(n, tile_m)

    # Only x gets padded per call (rows to tile multiple, features to 8).
    xp = jnp.zeros((np_, dinp), jnp.float32).at[:n, :d_in].set(x.astype(jnp.float32))

    grid = (np_ // tile_m,)

    out = pl.pallas_call(
        mlp_kernel,
        out_shape=jax.ShapeDtypeStruct((np_, n_outputs), jnp.float32),
        grid_spec=pltpu.PrefetchScalarGridSpec(
            num_scalar_prefetch=0,
            grid=grid,
            in_specs=[
                pl.BlockSpec((tile_m, dinp), lambda i: (i, 0)),   # x tile walks batch
                pl.BlockSpec((dinp, h1p), lambda i: (0, 0)),      # resident weights
                pl.BlockSpec((1, h1p), lambda i: (0, 0)),
                pl.BlockSpec((h1p, h2p), lambda i: (0, 0)),
                pl.BlockSpec((1, h2p), lambda i: (0, 0)),
                pl.BlockSpec((h2p, doutp), lambda i: (0, 0)),
                pl.BlockSpec((1, doutp), lambda i: (0, 0)),
            ],
            out_specs=pl.BlockSpec((tile_m, n_outputs), lambda i: (i, 0)),
        ),
        compiler_params=pltpu.CompilerParams(
            dimension_semantics=("parallel",),
        ),
    )(xp, w1p, b1p, w2p, b2p, w3p, b3p)

    return out[:n, :]


def init_linear(key, fan_in, fan_out):
    """Deterministic torch.nn.Linear-style init: U(-1/sqrt(fan_in), +1/sqrt(fan_in)).
    Weight stored as [fan_in, fan_out] (already transposed for x @ W)."""
    kw, kb = jax.random.split(key)
    bound = 1.0 / jnp.sqrt(jnp.float32(fan_in))
    w = jax.random.uniform(kw, (fan_in, fan_out), jnp.float32, -bound, bound)
    b = jax.random.uniform(kb, (fan_out,), jnp.float32, -bound, bound)
    return w, b


def _jax_reference(x, w1, b1, w2, b2, w3, b3):
    ref = jnp.maximum(x @ w1 + b1, 0.0)
    ref = jnp.maximum(ref @ w2 + b2, 0.0)
    return ref @ w3 + b3


if __name__ == "__main__":
    key = jax.random.PRNGKey(0)
    k_x, k_x2, k1, k2, k3 = jax.random.split(key, 5)

    # Shapes implied by the notebook: 5 input features (airfoil columns),
    # hidden layers [100, 100], 1 output.
    n_inputs, n_hidden1, n_hidden2, n_outputs = 5, 100, 100, 1

    w1, b1 = init_linear(k1, n_inputs, n_hidden1)
    w2, b2 = init_linear(k2, n_hidden1, n_hidden2)
    w3, b3 = init_linear(k3, n_hidden2, n_outputs)

    # One-time padding of the parameters (out of the per-call hot path).
    params = jax.block_until_ready(pad_params(w1, b1, w2, b2, w3, b3))

    # --- Small batch: whole batch in a single grid step ---
    batch = 16
    x = jax.random.normal(k_x, (batch, n_inputs), jnp.float32)
    y = nnet_forward(x, *params, n_outputs=n_outputs)
    y = jax.block_until_ready(y)
    ref = _jax_reference(x, w1, b1, w2, b2, w3, b3)
    assert y.shape == (batch, n_outputs)
    assert jnp.allclose(y, ref, atol=1e-4, rtol=1e-4)

    # --- Larger, non-multiple batch: exercises 1024-row tiles + row padding ---
    batch2 = 2000
    x2 = jax.random.normal(k_x2, (batch2, n_inputs), jnp.float32)
    y2 = nnet_forward(x2, *params, n_outputs=n_outputs)
    y2 = jax.block_until_ready(y2)
    ref2 = _jax_reference(x2, w1, b1, w2, b2, w3, b3)
    assert y2.shape == (batch2, n_outputs)
    assert jnp.allclose(y2, ref2, atol=1e-4, rtol=1e-4)

    print("KERNEL_OK")
</pallas_src>

<mosaic_0001>
module attributes {stable_mosaic.version = 11 : i64} {
  func.func @mlp_kernel(%arg0: i32, %arg1: memref<16x8xf32, #tpu.memory_space<vmem>>, %arg2: memref<8x128xf32, #tpu.memory_space<vmem>>, %arg3: memref<1x128xf32, #tpu.memory_space<vmem>>, %arg4: memref<128x128xf32, #tpu.memory_space<vmem>>, %arg5: memref<1x128xf32, #tpu.memory_space<vmem>>, %arg6: memref<128x128xf32, #tpu.memory_space<vmem>>, %arg7: memref<1x128xf32, #tpu.memory_space<vmem>>, %arg8: memref<16x1xf32, #tpu.memory_space<vmem>>) attributes {dimension_semantics = [#tpu.dimension_semantics<parallel>], iteration_bounds = array<i64: 1>, scalar_prefetch = 0 : i64, scratch_operands = 0 : i64, tpu.core_type = #tpu.core_type<tc>, window_params = [{transform_indices = @transform_0, window_bounds = array<i64: 16, 8>}, {pipeline_mode = #tpu.pipeline_mode<synchronous>, transform_indices = @transform_1, window_bounds = array<i64: 8, 128>}, {pipeline_mode = #tpu.pipeline_mode<synchronous>, transform_indices = @transform_2, window_bounds = array<i64: 1, 128>}, {pipeline_mode = #tpu.pipeline_mode<synchronous>, transform_indices = @transform_3, window_bounds = array<i64: 128, 128>}, {pipeline_mode = #tpu.pipeline_mode<synchronous>, transform_indices = @transform_4, window_bounds = array<i64: 1, 128>}, {pipeline_mode = #tpu.pipeline_mode<synchronous>, transform_indices = @transform_5, window_bounds = array<i64: 128, 128>}, {pipeline_mode = #tpu.pipeline_mode<synchronous>, transform_indices = @transform_6, window_bounds = array<i64: 1, 128>}, {transform_indices = @transform_7, window_bounds = array<i64: 16, 1>}]} {
    %c0 = arith.constant 0 : index
    %c0_0 = arith.constant 0 : index
    %0 = vector.load %arg1[%c0, %c0_0] : memref<16x8xf32, #tpu.memory_space<vmem>>, vector<16x8xf32>
    %c0_1 = arith.constant 0 : index
    %c0_2 = arith.constant 0 : index
    %1 = vector.load %arg2[%c0_1, %c0_2] : memref<8x128xf32, #tpu.memory_space<vmem>>, vector<8x128xf32>
    %cst = arith.constant dense<0.000000e+00> : vector<16x128xf32>
    %2 = tpu.matmul %0, %1, %cst {dimension_numbers = #tpu.dot_dimension_numbers<[1], [0], [0], [1], [0, 0, 1, 1], [], []>} : vector<16x8xf32>, vector<8x128xf32>, vector<16x128xf32> -> vector<16x128xf32>
    %c0_3 = arith.constant 0 : index
    %c0_4 = arith.constant 0 : index
    %3 = vector.load %arg3[%c0_3, %c0_4] : memref<1x128xf32, #tpu.memory_space<vmem>>, vector<1x128xf32>
    %4 = vector.broadcast %3 : vector<1x128xf32> to vector<16x128xf32>
    %5 = arith.addf %2, %4 : vector<16x128xf32>
    %cst_5 = arith.constant 0.000000e+00 : f32
    %6 = vector.broadcast %cst_5 : f32 to vector<16x128xf32>
    %7 = arith.maximumf %5, %6 : vector<16x128xf32>
    %c0_6 = arith.constant 0 : index
    %c0_7 = arith.constant 0 : index
    %8 = vector.load %arg4[%c0_6, %c0_7] : memref<128x128xf32, #tpu.memory_space<vmem>>, vector<128x128xf32>
    %cst_8 = arith.constant dense<0.000000e+00> : vector<16x128xf32>
    %9 = tpu.matmul %7, %8, %cst_8 {dimension_numbers = #tpu.dot_dimension_numbers<[1], [0], [0], [1], [0, 0, 1, 1], [], []>} : vector<16x128xf32>, vector<128x128xf32>, vector<16x128xf32> -> vector<16x128xf32>
    %c0_9 = arith.constant 0 : index
    %c0_10 = arith.constant 0 : index
    %10 = vector.load %arg5[%c0_9, %c0_10] : memref<1x128xf32, #tpu.memory_space<vmem>>, vector<1x128xf32>
    %11 = vector.broadcast %10 : vector<1x128xf32> to vector<16x128xf32>
    %12 = arith.addf %9, %11 : vector<16x128xf32>
    %cst_11 = arith.constant 0.000000e+00 : f32
    %13 = vector.broadcast %cst_11 : f32 to vector<16x128xf32>
    %14 = arith.maximumf %12, %13 : vector<16x128xf32>
    %c0_12 = arith.constant 0 : index
    %c0_13 = arith.constant 0 : index
    %15 = vector.load %arg6[%c0_12, %c0_13] : memref<128x128xf32, #tpu.memory_space<vmem>>, vector<128x128xf32>
    %cst_14 = arith.constant dense<0.000000e+00> : vector<16x128xf32>
    %16 = tpu.matmul %14, %15, %cst_14 {dimension_numbers = #tpu.dot_dimension_numbers<[1], [0], [0], [1], [0, 0, 1, 1], [], []>} : vector<16x128xf32>, vector<128x128xf32>, vector<16x128xf32> -> vector<16x128xf32>
    %c0_15 = arith.constant 0 : index
    %c0_16 = arith.constant 0 : index
    %17 = vector.load %arg7[%c0_15, %c0_16] : memref<1x128xf32, #tpu.memory_space<vmem>>, vector<1x128xf32>
    %18 = vector.broadcast %17 : vector<1x128xf32> to vector<16x128xf32>
    %19 = arith.addf %16, %18 : vector<16x128xf32>
    %20 = vector.extract_strided_slice %19 {offsets = [0, 0], sizes = [16, 1], strides = [1, 1]} : vector<16x128xf32> to vector<16x1xf32>
    %c0_17 = arith.constant 0 : index
    %c0_18 = arith.constant 0 : index
    %21 = vector.load %arg8[%c0_17, %c0_18] : memref<16x1xf32, #tpu.memory_space<vmem>>, vector<16x1xf32>
    tpu.vector_store %arg8[%c0_17, %c0_18], %20 {strides = array<i32>} : memref<16x1xf32, #tpu.memory_space<vmem>>, vector<16x1xf32>,
    return
  }
  func.func @transform_0(%arg0: i32) -> (i32, i32) {
    %c0_i32 = arith.constant 0 : i32
    %c0_i32_0 = arith.constant 0 : i32
    return %arg0, %c0_i32 : i32, i32
  }
  func.func @transform_1(%arg0: i32) -> (i32, i32) {
    %c0_i32 = arith.constant 0 : i32
    %c0_i32_0 = arith.constant 0 : i32
    %c0_i32_1 = arith.constant 0 : i32
    return %c0_i32, %c0_i32_0 : i32, i32
  }
  func.func @transform_2(%arg0: i32) -> (i32, i32) {
    %c0_i32 = arith.constant 0 : i32
    %c0_i32_0 = arith.constant 0 : i32
    %c0_i32_1 = arith.constant 0 : i32
    return %c0_i32, %c0_i32_0 : i32, i32
  }
  func.func @transform_3(%arg0: i32) -> (i32, i32) {
    %c0_i32 = arith.constant 0 : i32
    %c0_i32_0 = arith.constant 0 : i32
    %c0_i32_1 = arith.constant 0 : i32
    return %c0_i32, %c0_i32_0 : i32, i32
  }
  func.func @transform_4(%arg0: i32) -> (i32, i32) {
    %c0_i32 = arith.constant 0 : i32
    %c0_i32_0 = arith.constant 0 : i32
    %c0_i32_1 = arith.constant 0 : i32
    return %c0_i32, %c0_i32_0 : i32, i32
  }
  func.func @transform_5(%arg0: i32) -> (i32, i32) {
    %c0_i32 = arith.constant 0 : i32
    %c0_i32_0 = arith.constant 0 : i32
    %c0_i32_1 = arith.constant 0 : i32
    return %c0_i32, %c0_i32_0 : i32, i32
  }
  func.func @transform_6(%arg0: i32) -> (i32, i32) {
    %c0_i32 = arith.constant 0 : i32
    %c0_i32_0 = arith.constant 0 : i32
    %c0_i32_1 = arith.constant 0 : i32
    return %c0_i32, %c0_i32_0 : i32, i32
  }
  func.func @transform_7(%arg0: i32) -> (i32, i32) {
    %c0_i32 = arith.constant 0 : i32
    %c0_i32_0 = arith.constant 0 : i32
    return %arg0, %c0_i32 : i32, i32
  }
}

</mosaic_0001>

<bundles_post_ra>
// kernel: nnet_forward.1
= control target key start
LH: loop header
LB: loop body
LE: loop exit
PB: predicated region body
PF: predicated region fallthrough
CT: control target
= control target key end

     0   :  { %12 = vsyncpa [#allocation3], 0  ;;  %s596_s0 = inlined_call_operand.vmem [shape: f32[16,8], index: 0, kind: input, shape index: {}]   ;;  %s597_s1 = inlined_call_operand.vmem [shape: f32[8,128], index: 1, kind: input, shape index: {}]   ;;  %s598_s2 = inlined_call_operand.vmem [shape: f32[1,128], index: 2, kind: input, shape index: {}]   ;;  %s599_s3 = inlined_call_operand.hbm [shape: f32[128,128], index: 3, kind: input, shape index: {}]   ;;  %s600_s4 = inlined_call_operand.vmem [shape: f32[1,128], index: 4, kind: input, shape index: {}]   ;;  %s601_s5 = inlined_call_operand.hbm [shape: f32[128,128], index: 5, kind: input, shape index: {}]   ;;  %s602_s6 = inlined_call_operand.vmem [shape: f32[1,128], index: 6, kind: input, shape index: {}]   ;;  %s603_s7 = inlined_call_operand.vmem [shape: f32[16,1], index: 7, kind: output, shape index: {}]  }
   0x1   :  { %13 = vsyncpa [#allocation5], 0  ;;  %s522_s24 = smov [#allocation2]  }
   0x2   :  { %s25_s25 = sshll.u32 %s522_s24, 4  ;;  %s26_s25 = int_to_ptr.vmem [resolvable:$true] %s25_s25 }
   0x3   :  { %s486_s26 = scalar_lea.vmem %s26_s25, 2048  ;;  %p491_p1 = scmp.lt.s32.totalorder %s26_s25, %s26_s25 }
   0x4   :  { %p487_p0 = scmp.ne.s32.totalorder %s26_s25, %s486_s26  ;;  %p492_p2 = scmp.lt.s32.totalorder %s486_s26, %s486_s26 }
   0x6   :  { %p493_p3 = por %p492_p2, %p491_p1 }
   0x8   :  { %p494_p4 = pnand %p493_p3, %p487_p0 }
   0xa   :  { %497 = shalt.err (!%p494_p4)
}
   0xb   :  { %s523_s27 = smov 128   ;;  %s524_s28 = smov 8  }
   0xc   :  { %31 = dma.hbm_to_vmem [thread:$0]  %s599_s3, 2048, %s26_s25, [#allocation3], %s523_s27, %s523_s27, %s524_s28  }
   0xd   :  { %s525_s8 = smov [#allocation4]  }
   0xe   :  { %s39_s9 = sshll.u32 %s525_s8, 4  ;;  %s40_s9 = int_to_ptr.vmem [resolvable:$true] %s39_s9 }
   0xf   :  { %s506_s10 = scalar_lea.vmem %s40_s9, 2048  ;;  %p511_p6 = scmp.lt.s32.totalorder %s40_s9, %s40_s9 }
  0x10   :  { %p507_p5 = scmp.ne.s32.totalorder %s40_s9, %s506_s10  ;;  %p512_p7 = scmp.lt.s32.totalorder %s506_s10, %s506_s10 }
  0x12   :  { %p513_p8 = por %p512_p7, %p511_p6 }
  0x14   :  { %p514_p9 = pnand %p513_p8, %p507_p5 }
  0x16   :  { %517 = shalt.err (!%p514_p9)
}
  0x17   :  { %45 = dma.hbm_to_vmem [thread:$0]  %s601_s5, 2048, %s40_s9, [#allocation5], %s523_s27, %s523_s27, %s524_s28  }
  0x18   :  { %518 = dma.done.wait [#allocation3], 2048  }
  0x19   :  { %519 = vsyncadd [#allocation3], 4294965248 }
  0x1a   :  { %520 = dma.done.wait [#allocation5], 2048  }
  0x1b   :  { %521 = vsyncadd [#allocation5], 4294965248  ;;  %vm64_vm0 = vcmask 64512   ;;  %v56_v0 = vld [vmem:[%s597_s1] sm:$0xff]  ;;  %v55_v2 = vld [vmem:[%s596_s0 + $0x8] sm:$0xff]  ;;  %vm346_vm1 = vcmask 7168  }
  0x1c   :  { %v54_v1 = vld [vmem:[%s596_s0] sm:$0xff]  ;;  %399 = vmatprep.subr.mxu0 %v56_v0  ;;  %v163_v3 = vld [vmem:[#allocation2 + $0x78] sm:$0xff]  ;;  %v162_v4 = vld [vmem:[#allocation2 + $0x70] sm:$0xff] }
  0x1d   :  { %401 = vmatprep.mubr.msk.f32.mxu0 %vm64_vm0, %v54_v1  ;;  %400 = vmatpush3.msra.mxu0 %v56_v0  ;;  %v161_v5 = vld [vmem:[#allocation2 + $0x68] sm:$0xff]  ;;  %v160_v6 = vld [vmem:[#allocation2 + $0x60] sm:$0xff]  ;;  %v159_v7 = vld [vmem:[#allocation2 + $0x58] sm:$0xff] }
  0x1e   :  { %404 = vmatprep.subr.mxu1 %v163_v3  ;;  %402 = vmatmul.mubr.msk.f32.vlgmr.msra.gmra.mxu0 %vm64_vm0, %v55_v2  ;;  %v158_v8 = vld [vmem:[#allocation2 + $0x50] sm:$0xff]  ;;  %v157_v9 = vld [vmem:[#allocation2 + $0x48] sm:$0xff]  ;;  %v156_v10 = vld [vmem:[#allocation2 + $0x40] sm:$0xff] }
  0x1f   :  { %405 = vmatpush3.msra.mxu1 %v163_v3  ;;  %v155_v11 = vld [vmem:[#allocation2 + $0x38] sm:$0xff]  ;;  %v154_v12 = vld [vmem:[#allocation2 + $0x30] sm:$0xff]  ;;  %v153_v13 = vld [vmem:[#allocation2 + $0x28] sm:$0xff] }
  0x20   :  { %406 = vmatprep.subr.mxu1 %v162_v4  ;;  %v152_v14 = vld [vmem:[#allocation2 + $0x20] sm:$0xff]  ;;  %v151_v15 = vld [vmem:[#allocation2 + $0x18] sm:$0xff]  ;;  %v150_v16 = vld [vmem:[#allocation2 + $0x10] sm:$0xff] }
  0x21   :  { %407 = vmatpush3.msra.mxu1 %v162_v4  ;;  %v149_v17 = vld [vmem:[#allocation2 + $0x8] sm:$0xff]  ;;  %v148_v18 = vld [vmem:[#allocation2] sm:$0xff]  ;;  %v263_v19 = vld [vmem:[#allocation4 + $0x78] sm:$0xff] }
  0x22   :  { %408 = vmatprep.subr.mxu1 %v161_v5  ;;  %v262_v20 = vld [vmem:[#allocation4 + $0x70] sm:$0xff]  ;;  %439 = vmatprep.subr.mxu0 %v263_v19  ;;  %v261_v21 = vld [vmem:[#allocation4 + $0x68] sm:$0xff]  ;;  %v260_v22 = vld [vmem:[#allocation4 + $0x60] sm:$0xff] }
  0x23   :  { %409 = vmatpush3.msra.mxu1 %v161_v5  ;;  %440 = vmatpush3.msra.mxu0 %v263_v19  ;;  %v259_v23 = vld [vmem:[#allocation4 + $0x58] sm:$0xff]  ;;  %v258_v24 = vld [vmem:[#allocation4 + $0x50] sm:$0xff]  ;;  %v257_v25 = vld [vmem:[#allocation4 + $0x48] sm:$0xff] }
  0x24   :  { %410 = vmatprep.subr.mxu1 %v160_v6  ;;  %441 = vmatprep.subr.mxu0 %v262_v20  ;;  %v256_v26 = vld [vmem:[#allocation4 + $0x40] sm:$0xff]  ;;  %v255_v27 = vld [vmem:[#allocation4 + $0x38] sm:$0xff]  ;;  %v254_v28 = vld [vmem:[#allocation4 + $0x30] sm:$0xff] }
  0x25   :  { %411 = vmatpush3.msra.mxu1 %v160_v6  ;;  %442 = vmatpush3.msra.mxu0 %v262_v20  ;;  %v253_v29 = vld [vmem:[#allocation4 + $0x28] sm:$0xff]  ;;  %v252_v30 = vld [vmem:[#allocation4 + $0x20] sm:$0xff]  ;;  %v251_v38 = vld [vmem:[#allocation4 + $0x18] sm:$0xff] }
  0x26   :  { %412 = vmatprep.subr.mxu1 %v159_v7  ;;  %443 = vmatprep.subr.mxu0 %v261_v21  ;;  %v355_v31 = vld [vmem:[%s598_s2] ss:$0 sm:$0xff]  ;;  %v250_v39 = vld [vmem:[#allocation4 + $0x10] sm:$0xff]  ;;  %v249_v40 = vld [vmem:[#allocation4 + $0x8] sm:$0xff] }
  0x27   :  { %413 = vmatpush3.msra.mxu1 %v159_v7  ;;  %444 = vmatpush3.msra.mxu0 %v261_v21  ;;  %v248_v41 = vld [vmem:[#allocation4] sm:$0xff] }
  0x28   :  { %414 = vmatprep.subr.mxu1 %v158_v8  ;;  %445 = vmatprep.subr.mxu0 %v260_v22  ;;  %v358_v42 = vld [vmem:[%s600_s4] ss:$0 sm:$0xff] }
  0x29   :  { %415 = vmatpush3.msra.mxu1 %v158_v8  ;;  %446 = vmatpush3.msra.mxu0 %v260_v22  ;;  %v359_v49 = vld [vmem:[%s602_s6] ss:$0 sm:$0xff] }
  0x2a   :  { %416 = vmatprep.subr.mxu1 %v157_v9  ;;  %447 = vmatprep.subr.mxu0 %v259_v23 }
  0x2b   :  { %417 = vmatpush3.msra.mxu1 %v157_v9  ;;  %448 = vmatpush3.msra.mxu0 %v259_v23 }
  0x2c   :  { %418 = vmatprep.subr.mxu1 %v156_v10  ;;  %449 = vmatprep.subr.mxu0 %v258_v24 }
  0x2d   :  { %419 = vmatpush3.msra.mxu1 %v156_v10  ;;  %450 = vmatpush3.msra.mxu0 %v258_v24 }
  0x2e   :  { %420 = vmatprep.subr.mxu1 %v155_v11  ;;  %451 = vmatprep.subr.mxu0 %v257_v25 }
  0x2f   :  { %421 = vmatpush3.msra.mxu1 %v155_v11  ;;  %452 = vmatpush3.msra.mxu0 %v257_v25 }
  0x30   :  { %422 = vmatprep.subr.mxu1 %v154_v12  ;;  %453 = vmatprep.subr.mxu0 %v256_v26 }
  0x31   :  { %423 = vmatpush3.msra.mxu1 %v154_v12  ;;  %454 = vmatpush3.msra.mxu0 %v256_v26 }
  0x32   :  { %424 = vmatprep.subr.mxu1 %v153_v13  ;;  %455 = vmatprep.subr.mxu0 %v255_v27 }
  0x33   :  { %425 = vmatpush3.msra.mxu1 %v153_v13  ;;  %456 = vmatpush3.msra.mxu0 %v255_v27 }
  0x34   :  { %426 = vmatprep.subr.mxu1 %v152_v14  ;;  %457 = vmatprep.subr.mxu0 %v254_v28 }
  0x35   :  { %427 = vmatpush3.msra.mxu1 %v152_v14  ;;  %458 = vmatpush3.msra.mxu0 %v254_v28 }
  0x36   :  { %428 = vmatprep.subr.mxu1 %v151_v15  ;;  %459 = vmatprep.subr.mxu0 %v253_v29 }
  0x37   :  { %429 = vmatpush3.msra.mxu1 %v151_v15  ;;  %460 = vmatpush3.msra.mxu0 %v253_v29 }
  0x38   :  { %430 = vmatprep.subr.mxu1 %v150_v16  ;;  %461 = vmatprep.subr.mxu0 %v252_v30 }
  0x39   :  { %431 = vmatpush3.msra.mxu1 %v150_v16  ;;  %462 = vmatpush3.msra.mxu0 %v252_v30 }
  0x3a   :  { %432 = vmatprep.subr.mxu1 %v149_v17  ;;  %463 = vmatprep.subr.mxu0 %v251_v38 }
  0x3b   :  { %433 = vmatpush3.msra.mxu1 %v149_v17  ;;  %464 = vmatpush3.msra.mxu0 %v251_v38 }
  0x3c   :  { %434 = vmatprep.subr.mxu1 %v148_v18  ;;  %465 = vmatprep.subr.mxu0 %v250_v39 }
  0x3d   :  { %435 = vmatpush3.msra.mxu1 %v148_v18  ;;  %466 = vmatpush3.msra.mxu0 %v250_v39 }
  0x3e   :  { %467 = vmatprep.subr.mxu0 %v249_v40 }
  0x3f   :  { %468 = vmatpush3.msra.mxu0 %v249_v40 }
  0x40   :  { %469 = vmatprep.subr.mxu0 %v248_v41 }
  0x41   :  { %470 = vmatpush3.msra.mxu0 %v248_v41 }
  0xde   :  { %v403_v32 = vpop.f32.mrf.mxu0 }
  0xdf   :  { %v143_v33 = vadd.f32 %v403_v32, %v355_v31 }
  0xe0   :  { %v137_v34 = vpop.f32.mrf.mxu0 }
  0xe1   :  { %v138_v35 = vadd.f32 %v355_v31, %v137_v34  ;;  %v147_v37 = vmax.f32 %v143_v33, 0.0 }
  0xe3   :  { %v146_v36 = vmax.f32 %v138_v35, 0.0 }
  0xe5   :  { %436 = vmatprep.mubr.f32.mxu1 %v146_v36 }
  0xe6   :  { %437 = vmatmul.mubr.f32.vlgmr.msra.gmra.mxu1 %v147_v37 }
 0x1a6   :  { %v438_v43 = vpop.f32.mrf.mxu1 }
 0x1a7   :  { %v243_v44 = vadd.f32 %v438_v43, %v358_v42 }
 0x1a8   :  { %v237_v45 = vpop.f32.mrf.mxu1 }
 0x1a9   :  { %v238_v46 = vadd.f32 %v358_v42, %v237_v45  ;;  %v247_v48 = vmax.f32 %v243_v44, 0.0 }
 0x1ab   :  { %v246_v47 = vmax.f32 %v238_v46, 0.0 }
 0x1ad   :  { %471 = vmatprep.mubr.f32.mxu0 %v246_v47 }
 0x1ae   :  { %472 = vmatmul.mubr.f32.vlgmr.msra.gmra.mxu0 %v247_v48 }
 0x26e   :  { %v473_v50 = vpop.f32.mrf.mxu0 }
 0x26f   :  { %v343_v51 = vadd.f32 %v473_v50, %v359_v49 }
 0x270   :  { %v337_v52 = vpop.f32.mrf.mxu0 }
 0x271   :  { %348 = vst.msk [vmem:[%s603_s7 + $0x8] sm:$0xff] %vm346_vm1, %v343_v51  ;;  %v338_v53 = vadd.f32 %v359_v49, %v337_v52 }
 0x273   :  { %347 = vst.msk [vmem:[%s603_s7] sm:$0xff] %vm346_vm1, %v338_v53 }
 0x274   :  { %353 = vsyncpa [#allocation3], 1 }
 0x275   :  { %354 = vsyncpa [#allocation5], 1 }

</bundles_post_ra>
